<compile_context>
chip_gen: v6e
topology: v6e:2x2x1
jax: 0.10.0
libtpu: 0.0.40
codegen_flags: <defaults>
</compile_context>

<pallas_src>
import numpy as np
import jax
import jax.numpy as jnp
from jax.experimental import pallas as pl
from jax.experimental.pallas import tpu as pltpu


# ---------------- Tucker weight reconstruction (parameter glue, plain JAX) ----

def _n_mode_product(core, factor, mode):
    # Contract core's `mode` axis with factor's rank axis (axis 1); the new
    # axis of size factor.shape[0] takes the place of `mode` (same as torch).
    out = jnp.tensordot(core, factor, axes=([mode], [1]))
    return jnp.moveaxis(out, -1, mode)


def tucker_to_matrix(core, factors, in_modes, out_modes):
    t = core
    for ii, f in enumerate(factors):
        t = _n_mode_product(t, f, ii)
    return t.reshape(int(np.prod(in_modes)), int(np.prod(out_modes)))


# ---------------- Pallas kernels ----------------

def _matmul_bias_resident_kernel(x_ref, w_ref, b_ref, o_ref):
    # Whole W resident in VMEM; one MXU pass per batch tile.
    o_ref[...] = (
        jnp.dot(x_ref[...], w_ref[...], preferred_element_type=jnp.float32)
        + b_ref[...]
    ).astype(o_ref.dtype)


def _matmul_bias_stream_kernel(x_ref, w_ref, b_ref, o_ref):
    # The f32 output block is VMEM-resident across the trailing K axis:
    # write the bias once at k==0, then accumulate MXU partials into it.
    @pl.when(pl.program_id(2) == 0)
    def _():
        o_ref[...] = jnp.broadcast_to(b_ref[...], o_ref.shape)

    o_ref[...] += jnp.dot(
        x_ref[...], w_ref[...], preferred_element_type=jnp.float32
    )


# ---------------- helpers ----------------

def _round_up(x, m):
    return ((x + m - 1) // m) * m


def _pad2(a, rows, cols):
    r, c = a.shape
    if r == rows and c == cols:
        return a
    return jnp.pad(a, ((0, rows - r), (0, cols - c)))


def _pick_tile(dim_p, max_units=4):
    # dim_p is a multiple of 128; return the largest 128-multiple <= 128*max_units
    # that divides dim_p exactly (lane-dense tiles, zero extra padding).
    units = dim_p // 128
    for u in range(min(units, max_units), 0, -1):
        if units % u == 0:
            return u * 128
    return 128


def _vmem_capacity_bytes():
    try:
        return int(pltpu.get_tpu_info().vmem_capacity_bytes)
    except Exception:
        return 64 << 20   # conservative fallback (v7x per-TensorCore VMEM)


# ---------------- forward ----------------

def tucker_linear_forward(x, core, factors, bias, in_modes, out_modes, *,
                          mxu_dtype=jnp.float32, force_streaming=False):
    """y = x @ W + bias, W reconstructed from the Tucker core/factors.

    mxu_dtype=jnp.float32 reproduces the torch module's numerics exactly;
    jnp.bfloat16 (f32 accumulation) is the throughput option on v6e/v7x.
    """
    W = tucker_to_matrix(core, factors, in_modes, out_modes)      # (K, N) f32
    K, N = W.shape
    B = x.shape[0]
    if bias is None:
        bias = jnp.zeros((N,), dtype=jnp.float32)

    x_bytes = int(np.dtype(mxu_dtype).itemsize)
    row_align = 16 if x_bytes < 4 else 8      # bf16 packs 2 rows per sublane

    # ---- padding (decoupled from tile size) ----
    Bp = _round_up(B, row_align)
    Kp = _round_up(K, 128)
    Np = _round_up(N, 128)

    # ---- batch tile: minimize padded work while keeping tm reasonably big ----
    if Bp <= 256:
        tm = Bp
    else:
        cands = [c for c in (256, 128, 64, 32, 16, 8) if c % row_align == 0]
        padded = {c: _round_up(Bp, c) for c in cands}
        best = min(padded.values())
        tm = max(c for c in cands if padded[c] <= best * 9 // 8)
        Bp = padded[tm]

    # ---- K/N tiles: largest 128-multiples (<=512) dividing Kp/Np exactly ----
    tk = _pick_tile(Kp, 4)
    tn = _pick_tile(Np, 4)

    vmem_cap = _vmem_capacity_bytes()
    resident_budget = max(vmem_cap // 8, 4 << 20)  # ~16 MiB v5e/v6e, ~8 MiB v7x

    w_total = Kp * Np * x_bytes
    resident_footprint = (2 * w_total               # W (budget for double buffer)
                          + 2 * tm * Kp * x_bytes   # x tiles (double buffered)
                          + 2 * tm * Np * 4         # f32 output tiles
                          + Np * 4)                 # bias row
    use_resident = (not force_streaming) and resident_footprint <= resident_budget

    # ---- ensure >=2 parallel tiles so both v7x TensorCores get work ----
    n_parallel = (Bp // tm) * (1 if use_resident else Np // tn)
    if n_parallel < 2:
        split = [t for t in range(row_align, Bp, row_align) if Bp % t == 0]
        if split:
            tm = max(split)

    # ---- pad operands (cast to MXU dtype *before* padding) ----
    x_p = _pad2(x.astype(mxu_dtype), Bp, Kp)
    W_p = _pad2(W.astype(mxu_dtype), Kp, Np)
    b_p = jnp.pad(bias.astype(jnp.float32), (0, Np - N)).reshape(1, Np)

    if use_resident:
        footprint = resident_footprint
        w_reads = 1
    else:
        footprint = (2 * tm * tk * x_bytes + 2 * tk * tn * x_bytes
                     + 2 * tm * tn * 4 + 2 * tn * 4)
        w_reads = Bp // tm

    vmem_limit = None
    if footprint + (4 << 20) > (16 << 20):          # only raise past defaults
        vmem_limit = int(min(vmem_cap // 2, footprint + (4 << 20)))

    cost = pl.CostEstimate(
        flops=int(2 * Bp * Kp * Np),
        transcendentals=0,
        bytes_accessed=int(Bp * Kp * x_bytes + w_reads * Kp * Np * x_bytes
                           + Np * 4 + Bp * Np * 4),
    )

    if use_resident:
        # Grid only over batch tiles; W / bias fetched into VMEM once.
        y_p = pl.pallas_call(
            _matmul_bias_resident_kernel,
            out_shape=jax.ShapeDtypeStruct((Bp, Np), jnp.float32),
            grid_spec=pltpu.PrefetchScalarGridSpec(
                num_scalar_prefetch=0,
                grid=(Bp // tm,),
                in_specs=[
                    pl.BlockSpec((tm, Kp), lambda i: (i, 0)),   # x batch tile
                    pl.BlockSpec((Kp, Np), lambda i: (0, 0)),   # W: constant block
                    pl.BlockSpec((1, Np), lambda i: (0, 0)),    # bias row
                ],
                out_specs=pl.BlockSpec((tm, Np), lambda i: (i, 0)),
            ),
            compiler_params=pltpu.CompilerParams(
                dimension_semantics=("parallel",),
                vmem_limit_bytes=vmem_limit,
            ),
            cost_estimate=cost,
        )(x_p, W_p, b_p)
    else:
        # Streaming (M, N, K) matmul, reduction axis last, accumulate in output.
        y_p = pl.pallas_call(
            _matmul_bias_stream_kernel,
            out_shape=jax.ShapeDtypeStruct((Bp, Np), jnp.float32),
            grid_spec=pltpu.PrefetchScalarGridSpec(
                num_scalar_prefetch=0,
                grid=(Bp // tm, Np // tn, Kp // tk),
                in_specs=[
                    pl.BlockSpec((tm, tk), lambda i, j, k: (i, k)),  # x tile
                    pl.BlockSpec((tk, tn), lambda i, j, k: (k, j)),  # W tile
                    pl.BlockSpec((1, tn), lambda i, j, k: (0, j)),   # bias row
                ],
                out_specs=pl.BlockSpec((tm, tn), lambda i, j, k: (i, j)),
            ),
            compiler_params=pltpu.CompilerParams(
                dimension_semantics=("parallel", "parallel", "arbitrary"),
                vmem_limit_bytes=vmem_limit,
            ),
            cost_estimate=cost,
        )(x_p, W_p, b_p)

    return y_p[:B, :N]


# -------- deterministic parameter init (mirrors reset_parameters) --------

def init_tucker_params(key, in_modes, out_modes, ranks):
    d = len(in_modes)
    modes = list(in_modes) + list(out_modes)
    rr = list(ranks) + list(ranks)
    CONST = (0.05 / np.prod(rr) ** 0.5) ** (1.0 / (2 * d + 1))
    keys = jax.random.split(key, 1 + len(modes))
    core = CONST * jax.random.normal(keys[0], tuple(rr), dtype=jnp.float32)
    factors = [
        CONST * jax.random.normal(keys[1 + i], (modes[i], rr[i]), dtype=jnp.float32)
        for i in range(len(modes))
    ]
    bias = jnp.zeros((int(np.prod(out_modes)),), dtype=jnp.float32)  # zeroed bias
    return core, factors, bias


if __name__ == "__main__":
    in_modes = (4, 8)     # prod = 32 input features
    out_modes = (8, 4)    # prod = 32 output features
    ranks = (2, 3)
    B = 20                # not a tile multiple -> exercises the padding path

    key = jax.random.PRNGKey(0)
    kp, kx = jax.random.split(key)
    core, factors, bias = init_tucker_params(kp, in_modes, out_modes, ranks)
    x = jax.random.normal(kx, (B, int(np.prod(in_modes))), dtype=jnp.float32)

    W = tucker_to_matrix(core, factors, in_modes, out_modes)
    y_ref = x @ W + bias[None, :]

    # f32, W-resident fast path (matches torch numerics).
    y = jax.block_until_ready(
        tucker_linear_forward(x, core, factors, bias, in_modes, out_modes))
    assert y.shape == (B, int(np.prod(out_modes)))
    assert jnp.allclose(y, y_ref, atol=1e-5, rtol=1e-5)

    # Streaming (M,N,K) path with in-output accumulation (forced, for coverage).
    y_s = jax.block_until_ready(
        tucker_linear_forward(x, core, factors, bias, in_modes, out_modes,
                              force_streaming=True))
    assert jnp.allclose(y_s, y_ref, atol=1e-5, rtol=1e-5)

    # bf16 MXU path (v6e/v7x throughput option), f32 accumulation.
    y_bf16 = jax.block_until_ready(
        tucker_linear_forward(x, core, factors, bias, in_modes, out_modes,
                              mxu_dtype=jnp.bfloat16))
    assert jnp.allclose(y_bf16, y_ref, atol=5e-2, rtol=5e-2)

    print("KERNEL_OK")
</pallas_src>

<mosaic_0001>
module attributes {stable_mosaic.version = 11 : i64} {
  func.func @_matmul_bias_resident_kernel(%arg0: i32, %arg1: memref<8x128xf32, #tpu.memory_space<vmem>>, %arg2: memref<128x128xf32, #tpu.memory_space<vmem>>, %arg3: memref<1x128xf32, #tpu.memory_space<vmem>>, %arg4: memref<8x128xf32, #tpu.memory_space<vmem>>) attributes {dimension_semantics = [#tpu.dimension_semantics<parallel>], iteration_bounds = array<i64: 3>, scalar_prefetch = 0 : i64, scratch_operands = 0 : i64, tpu.core_type = #tpu.core_type<tc>, window_params = [{transform_indices = @transform_0, window_bounds = array<i64: 8, 128>}, {pipeline_mode = #tpu.pipeline_mode<synchronous>, transform_indices = @transform_1, window_bounds = array<i64: 128, 128>}, {pipeline_mode = #tpu.pipeline_mode<synchronous>, transform_indices = @transform_2, window_bounds = array<i64: 1, 128>}, {transform_indices = @transform_3, window_bounds = array<i64: 8, 128>}]} {
    %c0 = arith.constant 0 : index
    %c0_0 = arith.constant 0 : index
    %0 = vector.load %arg1[%c0, %c0_0] : memref<8x128xf32, #tpu.memory_space<vmem>>, vector<8x128xf32>
    %c0_1 = arith.constant 0 : index
    %c0_2 = arith.constant 0 : index
    %1 = vector.load %arg2[%c0_1, %c0_2] : memref<128x128xf32, #tpu.memory_space<vmem>>, vector<128x128xf32>
    %cst = arith.constant dense<0.000000e+00> : vector<8x128xf32>
    %2 = tpu.matmul %0, %1, %cst {dimension_numbers = #tpu.dot_dimension_numbers<[1], [0], [0], [1], [0, 0, 1, 1], [], []>} : vector<8x128xf32>, vector<128x128xf32>, vector<8x128xf32> -> vector<8x128xf32>
    %c0_3 = arith.constant 0 : index
    %c0_4 = arith.constant 0 : index
    %3 = vector.load %arg3[%c0_3, %c0_4] : memref<1x128xf32, #tpu.memory_space<vmem>>, vector<1x128xf32>
    %4 = vector.broadcast %3 : vector<1x128xf32> to vector<8x128xf32>
    %5 = arith.addf %2, %4 : vector<8x128xf32>
    %c0_5 = arith.constant 0 : index
    %c0_6 = arith.constant 0 : index
    %6 = vector.load %arg4[%c0_5, %c0_6] : memref<8x128xf32, #tpu.memory_space<vmem>>, vector<8x128xf32>
    tpu.vector_store %arg4[%c0_5, %c0_6], %5 {strides = array<i32>} : memref<8x128xf32, #tpu.memory_space<vmem>>, vector<8x128xf32>,
    return
  }
  func.func @transform_0(%arg0: i32) -> (i32, i32) {
    %c0_i32 = arith.constant 0 : i32
    %c0_i32_0 = arith.constant 0 : i32
    return %arg0, %c0_i32 : i32, i32
  }
  func.func @transform_1(%arg0: i32) -> (i32, i32) {
    %c0_i32 = arith.constant 0 : i32
    %c0_i32_0 = arith.constant 0 : i32
    %c0_i32_1 = arith.constant 0 : i32
    return %c0_i32, %c0_i32_0 : i32, i32
  }
  func.func @transform_2(%arg0: i32) -> (i32, i32) {
    %c0_i32 = arith.constant 0 : i32
    %c0_i32_0 = arith.constant 0 : i32
    %c0_i32_1 = arith.constant 0 : i32
    return %c0_i32, %c0_i32_0 : i32, i32
  }
  func.func @transform_3(%arg0: i32) -> (i32, i32) {
    %c0_i32 = arith.constant 0 : i32
    %c0_i32_0 = arith.constant 0 : i32
    return %arg0, %c0_i32 : i32, i32
  }
}

</mosaic_0001>

<bundles_post_ra>
// kernel: tpu_custom_call.1
= control target key start
LH: loop header
LB: loop body
LE: loop exit
PB: predicated region body
PF: predicated region fallthrough
CT: control target
= control target key end

     0   :  { %8 = vsyncpa [#allocation3], 0  ;;  %s837_s0 = inlined_call_operand.hbm [shape: f32[24,128], index: 0, kind: input, shape index: {}]   ;;  %s838_s1 = inlined_call_operand.hbm [shape: f32[128,128], index: 1, kind: input, shape index: {}]   ;;  %s839_s2 = inlined_call_operand.vmem [shape: f32[1,128], index: 2, kind: input, shape index: {}]   ;;  %s840_s3 = inlined_call_operand.hbm [shape: f32[24,128], index: 3, kind: output, shape index: {}]  }
   0x1   :  { %10 = vsyncpa [#allocation3 + $0x1], 0 }
   0x2   :  { %11 = vsyncpa [#allocation6], 0 }
   0x3   :  { %12 = vsyncpa [#allocation4], 0 }
   0x4   :  { %14 = vsyncpa [#allocation4 + $0x1], 0  ;;  %s669_s12 = smov 0   ;;  %s671_s13 = smov 0  }
   0x5   :  { %s673_s14 = smov 0   ;;  %s675_s15 = smov 0  }
   0x6 LB: > { %s690_s16 = sadd.s32 4294967295, %s640_s15   ;;  %s390_s17 = sadd.s32 4294967294, %s640_s15   ;;  %s640_s15 = sphi %s675_s15, %s861_s15   ;;  %s636_s14 = sphi %s673_s14, %s860_s14   ;;  %s632_s13 = sphi %s671_s13, %s859_s13   ;;  %s628_s12 = sphi %s669_s12, %s858_s12  }
   0x7   : > { %p40_p0 = scmp.ne.s32.totalorder %s632_s13, %s628_s12  ;;  %p841_p1 = scmp.eq.s32.totalorder %s690_s16, 0 }
   0x8   : > { %p112_p3 = scmp.eq.s32.totalorder %s390_s17, 2  ;;  %p391_p5 = scmp.ge.s32.totalorder %s640_s15, 1 }
   0x9   : > { %p699_p4 = por %p841_p1, %p40_p0  ;;  %p119_p7 = scmp.lt.s32.totalorder %s640_s15, 4 }
   0xa   : > { %p704_p6 = por %p112_p3, %p40_p0  ;;  %s642_s21 = smov [#allocation5]  }
   0xb   : > { %s845_s18 = scalar_select %p699_p4, 1, 0 }
   0xc   : > { %s846_s19 = scalar_select %p704_p6, 1, 0 }
   0xd   : > { %p709_p8 = pnand %p391_p5, %p119_p7  ;;  %s131_s22 = sshll.u32 %s642_s21, 4  ;;  %s132_s22 = int_to_ptr.vmem [resolvable:$true] %s131_s22 }
   0xe   : > { %s722_s24 = sadd.s32 1, %s640_s15   ;;  %s27_s25 = sadd.s32 1, %s636_s14 }
   0xf   : > { %s847_s20 = scalar_select %p709_p8, 1, 0 }
  0x10   : > { %p465_p9 = pneg %p709_p8  ;;  %s24_s26 = ssub.s32 %s640_s15, %s722_s24 }
  0x11   : > { %s529_s27 = scalar_lea.vmem %s132_s22, 2048  ;;  %p537_p3 = scmp.lt.s32.totalorder %s132_s22, %s132_s22 }
  0x12   : > { %p717_p10 = pnand %p465_p9, %p841_p1  ;;  %p530_p12 = scmp.ne.s32.totalorder %s132_s22, %s529_s27 }
  0x13   : > { %p538_p5 = scmp.lt.s32.totalorder %s529_s27, %s529_s27 }
  0x14   : > { %p520_p11 = pneg %p717_p10 }
  0x15   : > { %p539_p7 = por %p538_p5, %p537_p3 }
  0x16   : > { %p532_p13 = pnand %p530_p12, %p520_p11 }
  0x18   : > { %p533_p0 = pneg %p532_p13 }
  0x1a   : > { %p540_p2 = pnand %p539_p7, %p533_p0 }
  0x1c   : > { %543 = shalt.err (!%p540_p2)
}
  0x1d   : > { %s643_s28 = smov 128   ;;  %s644_s29 = smov 8  }
  0x1e   : > { %468 = dma.hbm_to_vmem [thread:$0]  (!%p717_p10), %s838_s1, 2048, %s132_s22, [#allocation6], %s643_s28, %s643_s28, %s644_s29  }
  0x1f   : > { %p25_p9 = scmp.eq.s32.totalorder %s24_s26, 0  ;;  %p34_p11 = scmp.ne.s32.totalorder %s636_s14, %s632_s13 }
  0x20   : > { %p35_p12 = scmp.eq.s32.totalorder %s640_s15, 0  ;;  %p478_p2 = scmp.lt.s32.totalorder %s640_s15, 3 }
  0x21   : > { %s739_s5 = scalar_select %p25_p9, %s636_s14, %s27_s25  }
  0x22   : > { %p36_p13 = por %p35_p12, %p34_p11  ;;  %p849_p0 = scmp.eq.s32.totalorder %s690_s16, 2 }
  0x23   : > { %s148_s7 = sand.u32 1, %s636_s14   ;;  %s395_s8 = sshll.u32 %s640_s15, 7 }
  0x24   : > { %p743_p3 = por %p849_p0, %p34_p11  ;;  %s394_s9 = sshll.u32 %s148_s7, 3 }
  0x25   : > { %s752_s17 = scalar_lea.hbm %s837_s0, %s395_s8  ;;  %s152_s21 = scalar_lea.vmem [#allocation2], %s394_s9 }
  0x26   : > { %s850_s6 = scalar_select %p743_p3, 1, 0 }
  0x27   : > { %s159_s22 = sshll.u32 %s152_s21, 4  ;;  %p754_p10 = pnand %p478_p2, %p36_p13  ;;  %s160_s22 = int_to_ptr.vmem [resolvable:$true] %s159_s22 }
  0x28   : > { %s149_s25 = scalar_lea.sflag [#allocation3], %s148_s7  ;;  %s544_s26 = scalar_lea.hbm %s752_s17, 128 }
  0x29   : > { %p545_p5 = scmp.ne.s32.totalorder %s752_s17, %s544_s26  ;;  %p546_p7 = pneg %p754_p10 }
  0x2a   : > { %s549_s29 = scalar_lea.hbm %s837_s0, 384  ;;  %p550_p12 = scmp.lt.s32.totalorder %s752_s17, %s837_s0 }
  0x2b   : > { %p547_p9 = pnand %p546_p7, %p545_p5  ;;  %p551_p2 = scmp.lt.s32.totalorder %s549_s29, %s544_s26 }
  0x2d   : > { %p548_p11 = pneg %p547_p9  ;;  %p552_p13 = por %p551_p2, %p550_p12 }
  0x2f   : > { %p553_p0 = pnand %p552_p13, %p548_p11 }
  0x31   : > { %556 = shalt.err (!%p553_p0)
}
  0x32   : > { %s557_s8 = scalar_lea.vmem %s160_s22, 128  ;;  %s645_s7 = smov [#allocation2]  }
  0x33   : > { %p558_p1 = scmp.ne.s32.totalorder %s160_s22, %s557_s8  ;;  %s562_s9 = sshll.u32 %s645_s7, 4  ;;  %s563_s9 = int_to_ptr.vmem [resolvable:$false] %s562_s9 }
  0x34   : > { %s564_s10 = scalar_lea.vmem %s563_s9, 256  ;;  %p565_p5 = scmp.lt.s32.totalorder %s160_s22, %s563_s9 }
  0x35   : > { %p560_p6 = pnand %p558_p1, %p546_p7  ;;  %p566_p9 = scmp.lt.s32.totalorder %s564_s10, %s557_s8 }
  0x37   : > { %p561_p3 = pneg %p560_p6  ;;  %p567_p4 = por %p566_p9, %p565_p5 }
  0x39   : > { %p568_p8 = pnand %p567_p4, %p561_p3 }
  0x3b   : > { %571 = shalt.err (!%p568_p8)
}
  0x3c   : > { %472 = dma.hbm_to_vmem [thread:$0]  (!%p754_p10), %s752_s17, 128, %s160_s22, %s149_s25  }
  0x3d   : > { %p852_p11 = scmp.ne.s32.totalorder %s847_s20, 0 }
  0x3e   : > { %s775_s11 = sand.u32 (!%p852_p11), 1, %s632_s13   ;;  %p853_p1 = scmp.ne.s32.totalorder (!%p852_p11), %s845_s18, 0 }
  0x3f   : > { %168 = sbr.rel (%p852_p11) target bundleno = 313 (0x139), region = 32  ;;  %s397_s21 = sshll.u32 (!%p852_p11), %s775_s11, 3 }
  0x40   : > { %s171_s26 = scalar_lea.sflag (!%p852_p11), [#allocation3], %s775_s11  ;;  %s781_s27 = scalar_lea.vmem (!%p852_p11), [#allocation2], %s397_s21 }
  0x44   : > { %615 = dma.done.wait (%p853_p1), %s171_s26, 128  }
  0x45   : > { %617 = vsyncadd (%p853_p1), %s171_s26, 4294967168  ;;  %p854_p4 = scmp.eq.s32.totalorder %s690_s16, 0 }
  0x47   : > { %619 = dma.done.wait (%p854_p4), [#allocation6], 2048   ;;  %p855_p6 = pmov %p854_p4 }
  0x48   : > { %v646_v0 = vmov 0.0   ;;  %vm647_vm0 = vmmov 0   ;;  %v217_v1 = vld [vmem:[#allocation5 + $0x78] sm:$0xff]  ;;  %v216_v2 = vld [vmem:[#allocation5 + $0x70] sm:$0xff]  ;;  %v215_v3 = vld [vmem:[#allocation5 + $0x68] sm:$0xff]  ;;  %s402_s17 = sshll.u32 %s690_s16, 7 }
  0x49   : > { %621 = vsyncadd (%p855_p6), [#allocation6], 4294965248  ;;  %422 = vmatprep.subr.mxu0 %v646_v0  ;;  %454 = vmatprep.mubr.msk.f32.mxu0 %vm647_vm0, %v646_v0  ;;  %v214_v4 = vld [vmem:[#allocation5 + $0x60] sm:$0xff]  ;;  %v213_v5 = vld [vmem:[#allocation5 + $0x58] sm:$0xff]  ;;  %s200_s22 = scalar_lea.vmem [#allocation7], %s397_s21  ;;  %s801_s29 = scalar_lea.hbm %s840_s3, %s402_s17 }
  0x4a   : > { %423 = vmatpush3.msra.mxu0 %v217_v1  ;;  %v212_v6 = vld [vmem:[#allocation5 + $0x50] sm:$0xff]  ;;  %v211_v7 = vld [vmem:[#allocation5 + $0x48] sm:$0xff]  ;;  %v210_v8 = vld [vmem:[#allocation5 + $0x40] sm:$0xff]  ;;  %s310_s23 = sshll.u32 %s200_s22, 4  ;;  %s297_s30 = scalar_lea.sflag [#allocation4], %s775_s11  ;;  %s311_s23 = int_to_ptr.vmem [resolvable:$true] %s310_s23 }
  0x4b   : > { %424 = vmatprep.subr.mxu0 %v646_v0  ;;  %v209_v9 = vld [vmem:[#allocation5 + $0x38] sm:$0xff]  ;;  %v208_v10 = vld [vmem:[#allocation5 + $0x30] sm:$0xff]  ;;  %v207_v11 = vld [vmem:[#allocation5 + $0x28] sm:$0xff]  ;;  %s572_s4 = scalar_lea.vmem %s311_s23, 128  ;;  %p856_p3 = scmp.ne.s32.totalorder %s850_s6, 0 }
  0x4c   : > { %425 = vmatpush3.msra.mxu0 %v216_v2  ;;  %v206_v12 = vld [vmem:[#allocation5 + $0x20] sm:$0xff]  ;;  %v205_v13 = vld [vmem:[#allocation5 + $0x18] sm:$0xff]  ;;  %v204_v14 = vld [vmem:[#allocation5 + $0x10] sm:$0xff]  ;;  %p573_p8 = scmp.ne.s32.totalorder %s311_s23, %s572_s4  ;;  %s648_s16 = smov [#allocation7]  }
  0x4d   : > { %426 = vmatprep.subr.mxu0 %v646_v0  ;;  %v203_v15 = vld [vmem:[#allocation5 + $0x8] sm:$0xff]  ;;  %v202_v16 = vld [vmem:[#allocation5] sm:$0xff]  ;;  %v201_v17 = vld [vmem:[%s781_s27] sm:$0xff]  ;;  %s576_s8 = sshll.u32 %s648_s16, 4  ;;  %s577_s8 = int_to_ptr.vmem [resolvable:$false] %s576_s8 }
  0x4e   : > { %427 = vmatpush3.msra.mxu0 %v215_v3  ;;  %v400_v18 = vld [vmem:[%s839_s2] ss:$0 sm:$0xff]  ;;  %p574_p10 = pnand %p573_p8, %p856_p3  ;;  %s578_s7 = scalar_lea.vmem %s577_s8, 256 }
  0x4f   : > { %428 = vmatprep.subr.mxu0 %v646_v0  ;;  %p579_p12 = scmp.lt.s32.totalorder %s311_s23, %s577_s8  ;;  %p580_p2 = scmp.lt.s32.totalorder %s578_s7, %s572_s4 }
  0x50   : > { %429 = vmatpush3.msra.mxu0 %v214_v4  ;;  %p575_p7 = pneg %p574_p10 }
  0x51   : > { %430 = vmatprep.subr.mxu0 %v646_v0  ;;  %p581_p13 = por %p580_p2, %p579_p12 }
  0x52   : > { %431 = vmatpush3.msra.mxu0 %v213_v5 }
  0x53   : > { %432 = vmatprep.subr.mxu0 %v646_v0  ;;  %p582_p0 = pnand %p581_p13, %p575_p7 }
  0x54   : > { %433 = vmatpush3.msra.mxu0 %v212_v6 }
  0x55   : > { %434 = vmatprep.subr.mxu0 %v646_v0 }
  0x56   : > { %435 = vmatpush3.msra.mxu0 %v211_v7 }
  0x57   : > { %436 = vmatprep.subr.mxu0 %v646_v0 }
  0x58   : > { %437 = vmatpush3.msra.mxu0 %v210_v8 }
  0x59   : > { %438 = vmatprep.subr.mxu0 %v646_v0 }
  0x5a   : > { %439 = vmatpush3.msra.mxu0 %v209_v9 }
  0x5b   : > { %440 = vmatprep.subr.mxu0 %v646_v0 }
  0x5c   : > { %441 = vmatpush3.msra.mxu0 %v208_v10 }
  0x5d   : > { %442 = vmatprep.subr.mxu0 %v646_v0 }
  0x5e   : > { %443 = vmatpush3.msra.mxu0 %v207_v11 }
  0x5f   : > { %444 = vmatprep.subr.mxu0 %v646_v0 }
  0x60   : > { %445 = vmatpush3.msra.mxu0 %v206_v12 }
  0x61   : > { %446 = vmatprep.subr.mxu0 %v646_v0 }
  0x62   : > { %447 = vmatpush3.msra.mxu0 %v205_v13 }
  0x63   : > { %448 = vmatprep.subr.mxu0 %v646_v0 }
  0x64   : > { %449 = vmatpush3.msra.mxu0 %v204_v14 }
  0x65   : > { %450 = vmatprep.subr.mxu0 %v646_v0 }
  0x66   : > { %451 = vmatpush3.msra.mxu0 %v203_v15 }
  0x67   : > { %452 = vmatprep.subr.mxu0 %v646_v0 }
  0x68   : > { %453 = vmatpush3.msra.mxu0 %v202_v16 }
  0x69   : > { %455 = vmatmul.mubr.f32.vlgmr.msra.gmra.mxu0 %v201_v17 }
 0x129   : > { %v291_v19 = vpop.f32.mrf.mxu0 }
 0x12a   : > { %v292_v20 = vadd.f32 %v400_v18, %v291_v19 }
 0x12b   : > { %v456_v21 = vpop.f32.mrf.mxu0 }
 0x12c   : > { %295 = vst [vmem:[%s200_s22] sm:$0xff] %v292_v20 }
 0x12d   : > { %585 = shalt.err (!%p582_p0)
}
 0x12e   : > { %s586_s9 = scalar_lea.hbm %s801_s29, 128  ;;  %s590_s21 = scalar_lea.hbm %s840_s3, 384 }
 0x12f   : > { %p587_p5 = scmp.ne.s32.totalorder %s801_s29, %s586_s9  ;;  %p591_p1 = scmp.lt.s32.totalorder %s801_s29, %s840_s3 }
 0x130   : > { %p592_p4 = scmp.lt.s32.totalorder %s590_s21, %s586_s9 }
 0x131   : > { %p588_p9 = pnand %p587_p5, %p856_p3 }
 0x132   : > { %p593_p6 = por %p592_p4, %p591_p1 }
 0x133   : > { %p589_p11 = pneg %p588_p9 }
 0x135   : > { %p594_p8 = pnand %p593_p6, %p589_p11 }
 0x137   : > { %597 = shalt.err (!%p594_p8)
}
 0x138   : > { %463 = dma.vmem_to_hbm [thread:$0]  (%p856_p3), %s311_s23, 128, %s801_s29, %s297_s30  }
 0x139 PF: > { %p480_p10 = scmp.ge.s32.totalorder %s640_s15, 2  ;;  %s322_s18 = sand.u32 1, %s628_s12  }
 0x13a   : > { %p857_p7 = scmp.ne.s32.totalorder %s846_s19, 0  ;;  %s323_s20 = scalar_lea.sflag [#allocation4], %s322_s18 }
 0x13c   : > { %p474_p12 = pnand %p480_p10, %p857_p7 }
 0x13e   : > { %p475_p2 = pneg %p474_p12 }
 0x140   : > { %623 = dma.done.wait (%p475_p2), %s323_s20, 128  }
 0x141   : > { %625 = vsyncadd (%p475_p2), %s323_s20, 4294967168  ;;  %p17_p13 = scmp.ge.s32.totalorder %s722_s24, 5   ;;  %s858_s12 = smov %s632_s13 }
 0x142   : > { %s859_s13 = smov %s636_s14  ;;  %s860_s14 = smov %s739_s5 }
 0x143   : > { %s861_s15 = smov %s722_s24  ;;  %19 = sbr.rel (!%p17_p13) target bundleno = 6 (0x6), region = 81 }
 0x148   :  { %328 = vsyncpa [#allocation3], 1 }
 0x149   :  { %330 = vsyncpa [#allocation3 + $0x1], 1 }
 0x14a   :  { %331 = vsyncpa [#allocation6], 1 }
 0x14b   :  { %332 = vsyncpa [#allocation4], 1 }
 0x14c   :  { %334 = vsyncpa [#allocation4 + $0x1], 1 }

</bundles_post_ra>
